<compile_context>
chip_gen: v7x
topology: tpu7x:2x2x1
jax: 0.10.0
libtpu: 0.0.40
codegen_flags: <defaults>
</compile_context>

<pallas_src>
import functools
import math

import jax
import jax.numpy as jnp
from jax.experimental import pallas as pl
from jax.experimental.pallas import tpu as pltpu


def _combined_pooling_kernel(x_ref, attn_w_ref, attn_b_ref, pool_w_ref,
                             pool_b_ref, out_ref,
                             sum_acc, max_acc, m_acc, l_acc, attn_acc,
                             *, seq_len):
    s_idx = pl.program_id(1)

    @pl.when(s_idx == 0)
    def _init():
        sum_acc[...] = jnp.zeros_like(sum_acc)
        max_acc[...] = jnp.full_like(max_acc, -jnp.inf)
        m_acc[...] = jnp.full_like(m_acc, -jnp.inf)      # softmax running max
        l_acc[...] = jnp.zeros_like(l_acc)               # softmax running denom
        attn_acc[...] = jnp.zeros_like(attn_acc)

    x = x_ref[...]                                       # [tS, tB, D] native dtype
    D = x.shape[-1]

    # ---- one fused sweep over this S tile ----
    # running sum (f32 accumulation) and running max
    sum_acc[...] += jnp.sum(x.astype(jnp.float32), axis=0)          # [tB, D]
    max_acc[...] = jnp.maximum(max_acc[...],
                               jnp.max(x, axis=0).astype(jnp.float32))

    # attention scores for this tile: s[t,b] = sum_d x[t,b,d]*w[d] + bias
    w = attn_w_ref[...].reshape(1, 1, D)                 # [1,1,D], x.dtype
    scores = jnp.sum((x * w).astype(jnp.float32), axis=-1, keepdims=True)
    scores = scores + attn_b_ref[0]                      # [tS, tB, 1]

    # online softmax over the sequence axis
    m_prev = m_acc[...]                                  # [tB, 1]
    m_new = jnp.maximum(m_prev, jnp.max(scores, axis=0))  # [tB, 1]
    alpha = jnp.exp(m_prev - m_new)                      # [tB, 1]
    p = jnp.exp(scores - m_new)                          # [tS, tB, 1]
    l_acc[...] = alpha * l_acc[...] + jnp.sum(p, axis=0)
    attn_acc[...] = alpha * attn_acc[...] + jnp.sum(x * p, axis=0)   # [tB, D]
    m_acc[...] = m_new

    @pl.when(s_idx == pl.num_programs(1) - 1)
    def _finalize():
        mean_pool = sum_acc[...] * jnp.float32(1.0 / seq_len)        # [tB, D]
        max_pool = max_acc[...]                                      # [tB, D]
        # reciprocal on the EUP + one Newton step (keeps full f32 accuracy)
        inv_l = pl.reciprocal(l_acc[...], approx=True)
        inv_l = inv_l * (2.0 - l_acc[...] * inv_l)
        attn_pool = attn_acc[...] * inv_l                            # [tB, D]

        # pooling_linear on cat([mean, max, attn], dim=1) as a split matmul:
        #   cat([m,x,a]) @ W == m @ W[0:D] + x @ W[D:2D] + a @ W[2D:3D]
        wdt = pool_w_ref.dtype
        out = (jnp.dot(mean_pool.astype(wdt), pool_w_ref[0:D, :],
                       preferred_element_type=jnp.float32)
               + jnp.dot(max_pool.astype(wdt), pool_w_ref[D:2 * D, :],
                         preferred_element_type=jnp.float32)
               + jnp.dot(attn_pool.astype(wdt), pool_w_ref[2 * D:3 * D, :],
                         preferred_element_type=jnp.float32)
               + pool_b_ref[...].astype(jnp.float32))                # [tB, D]
        out_ref[...] = out.astype(out_ref.dtype)


def combined_pooling(x, attn_w, attn_b, pool_w, pool_b, *,
                     tile_s=None, tile_b=None,
                     vmem_limit_bytes=32 * 1024 * 1024):
    """x: [S, B, D]; attn_w: [1, D]; attn_b: [1]; pool_w: [3D, D]; pool_b: [D]."""
    S, B, D = x.shape
    assert attn_w.shape[-1] == D and pool_w.shape == (3 * D, D)

    # ---- batch tile: must equal B or be a multiple of 8 dividing B ----
    if tile_b is None:
        tile_b = B
        if B % 8 == 0:
            for cand in (512, 256, 128, 64, 32, 16, 8):
                if cand <= B and B % cand == 0:
                    tile_b = cand
                    break
    assert B % tile_b == 0 and (tile_b == B or tile_b % 8 == 0), (B, tile_b)

    # ---- seq tile: largest divisor of S whose double-buffered x tile fits ----
    if tile_s is None:
        itemsize = jnp.dtype(x.dtype).itemsize
        per_row = max(1, tile_b * D * itemsize)
        # x is double-buffered; keep 2 * tile well under the scoped VMEM limit
        # (also leaves headroom for accumulators/weights and for v7x's 64 MiB).
        max_ts = max(1, (vmem_limit_bytes // 4) // per_row)
        tile_s = 1
        for cand in range(1, S + 1):
            if S % cand == 0 and cand <= max_ts:
                tile_s = cand
    assert S % tile_s == 0, (S, tile_s)

    grid = (B // tile_b, S // tile_s)
    kernel = functools.partial(_combined_pooling_kernel, seq_len=S)

    return pl.pallas_call(
        kernel,
        out_shape=jax.ShapeDtypeStruct((B, D), x.dtype),
        grid=grid,
        in_specs=[
            pl.BlockSpec((tile_s, tile_b, D), lambda b, s: (s, b, 0)),   # x
            pl.BlockSpec((1, D), lambda b, s: (0, 0)),                   # attn_w
            pl.BlockSpec(memory_space=pltpu.MemorySpace.SMEM),           # attn_b
            pl.BlockSpec((3 * D, D), lambda b, s: (0, 0)),               # pool_w
            pl.BlockSpec((1, D), lambda b, s: (0, 0)),                   # pool_b
        ],
        out_specs=pl.BlockSpec((tile_b, D), lambda b, s: (b, 0)),
        scratch_shapes=[
            pltpu.VMEM((tile_b, D), jnp.float32),   # running sum  (mean)
            pltpu.VMEM((tile_b, D), jnp.float32),   # running max
            pltpu.VMEM((tile_b, 1), jnp.float32),   # softmax running max m
            pltpu.VMEM((tile_b, 1), jnp.float32),   # softmax running denom l
            pltpu.VMEM((tile_b, D), jnp.float32),   # attention-weighted acc
        ],
        compiler_params=pltpu.CompilerParams(
            dimension_semantics=("parallel", "arbitrary"),
            vmem_limit_bytes=vmem_limit_bytes,
        ),
    )(x,
      attn_w.reshape(1, D).astype(x.dtype),
      attn_b.reshape(1).astype(jnp.float32),
      pool_w,
      pool_b.reshape(1, D).astype(jnp.float32))


def combined_pooling_ref(x, attn_w, attn_b, pool_w, pool_b):
    """Plain-JAX reference mirroring the PyTorch forward."""
    mean_pool = x.mean(axis=0)
    max_pool = x.max(axis=0)
    scores = jnp.einsum('sbd,d->sb', x, attn_w[0]) + attn_b[0]
    wts = jax.nn.softmax(scores, axis=0)
    attn_pool = jnp.sum(x * wts[:, :, None], axis=0)
    combined = jnp.concatenate([mean_pool, max_pool, attn_pool], axis=1)
    return combined @ pool_w + pool_b


if __name__ == "__main__":
    S, B, D = 8, 2, 32   # seq_len, batch_size, d_model

    key = jax.random.PRNGKey(0)
    kx, kw1, kb1, kw2, kb2 = jax.random.split(key, 5)

    x = jax.random.normal(kx, (S, B, D), dtype=jnp.float32)

    # nn.Linear(d_model, 1): weight [1, D], bias [1]
    b1 = 1.0 / math.sqrt(D)
    attn_w = jax.random.uniform(kw1, (1, D), jnp.float32, -b1, b1)
    attn_b = jax.random.uniform(kb1, (1,), jnp.float32, -b1, b1)

    # nn.Linear(3*d_model, d_model): stored pre-transposed as [3D, D]
    b2 = 1.0 / math.sqrt(3 * D)
    pool_w = jax.random.uniform(kw2, (3 * D, D), jnp.float32, -b2, b2)
    pool_b = jax.random.uniform(kb2, (D,), jnp.float32, -b2, b2)

    ref = combined_pooling_ref(x, attn_w, attn_b, pool_w, pool_b)

    # Run once with the default (single S step) tiling and once with a forced
    # multi-step S reduction to exercise the online-softmax accumulation path.
    for ts in (None, 2):
        out = jax.block_until_ready(
            combined_pooling(x, attn_w, attn_b, pool_w, pool_b, tile_s=ts))
        assert out.shape == (B, D), out.shape
        err = jnp.max(jnp.abs(out - ref))
        assert jnp.allclose(out, ref, atol=1e-4, rtol=1e-4), (
            f"max abs err = {err} (tile_s={ts})")

    print("KERNEL_OK")
</pallas_src>

<mosaic_0001>
module attributes {stable_mosaic.version = 11 : i64} {
  func.func @_combined_pooling_kernel(%arg0: i32, %arg1: i32, %arg2: memref<8x2x32xf32, #tpu.memory_space<vmem>>, %arg3: memref<1x32xf32, #tpu.memory_space<vmem>>, %arg4: memref<1xf32, #tpu.memory_space<smem>>, %arg5: memref<96x32xf32, #tpu.memory_space<vmem>>, %arg6: memref<1x32xf32, #tpu.memory_space<vmem>>, %arg7: memref<2x32xf32, #tpu.memory_space<vmem>>, %arg8: memref<2x32xf32, #tpu.memory_space<vmem>>, %arg9: memref<2x32xf32, #tpu.memory_space<vmem>>, %arg10: memref<2x1xf32, #tpu.memory_space<vmem>>, %arg11: memref<2x1xf32, #tpu.memory_space<vmem>>, %arg12: memref<2x32xf32, #tpu.memory_space<vmem>>) attributes {dimension_semantics = [#tpu.dimension_semantics<parallel>, #tpu.dimension_semantics<arbitrary>], iteration_bounds = array<i64: 1, 1>, scalar_prefetch = 0 : i64, scratch_operands = 5 : i64, tpu.core_type = #tpu.core_type<tc>, window_params = [{transform_indices = @transform_0, window_bounds = array<i64: 8, 2, 32>}, {pipeline_mode = #tpu.pipeline_mode<synchronous>, transform_indices = @transform_1, window_bounds = array<i64: 1, 32>}, {transform_indices = @transform_2, window_bounds = array<i64: 1>}, {pipeline_mode = #tpu.pipeline_mode<synchronous>, transform_indices = @transform_3, window_bounds = array<i64: 96, 32>}, {pipeline_mode = #tpu.pipeline_mode<synchronous>, transform_indices = @transform_4, window_bounds = array<i64: 1, 32>}, {transform_indices = @transform_5, window_bounds = array<i64: 2, 32>}]} {
    %c0_i32 = arith.constant 0 : i32
    %0 = arith.cmpi eq, %arg1, %c0_i32 : i32
    %1 = arith.extui %0 : i1 to i32
    %c0_i32_0 = arith.constant 0 : i32
    %2 = arith.cmpi ne, %1, %c0_i32_0 : i32
    scf.if %2 {
      %cst_33 = arith.constant 0.000000e+00 : f32
      %47 = vector.broadcast %cst_33 : f32 to vector<2x32xf32>
      %c0_34 = arith.constant 0 : index
      %c0_35 = arith.constant 0 : index
      %48 = vector.load %arg8[%c0_34, %c0_35] : memref<2x32xf32, #tpu.memory_space<vmem>>, vector<2x32xf32>
      tpu.vector_store %arg8[%c0_34, %c0_35], %47 {strides = array<i32>} : memref<2x32xf32, #tpu.memory_space<vmem>>, vector<2x32xf32>,
      %cst_36 = arith.constant 0xFF800000 : f32
      %49 = vector.broadcast %cst_36 : f32 to vector<2x32xf32>
      %c0_37 = arith.constant 0 : index
      %c0_38 = arith.constant 0 : index
      %50 = vector.load %arg9[%c0_37, %c0_38] : memref<2x32xf32, #tpu.memory_space<vmem>>, vector<2x32xf32>
      tpu.vector_store %arg9[%c0_37, %c0_38], %49 {strides = array<i32>} : memref<2x32xf32, #tpu.memory_space<vmem>>, vector<2x32xf32>,
      %cst_39 = arith.constant 0xFF800000 : f32
      %51 = vector.broadcast %cst_39 : f32 to vector<2x1xf32>
      %c0_40 = arith.constant 0 : index
      %c0_41 = arith.constant 0 : index
      %52 = vector.load %arg10[%c0_40, %c0_41] : memref<2x1xf32, #tpu.memory_space<vmem>>, vector<2x1xf32>
      tpu.vector_store %arg10[%c0_40, %c0_41], %51 {strides = array<i32>} : memref<2x1xf32, #tpu.memory_space<vmem>>, vector<2x1xf32>,
      %cst_42 = arith.constant 0.000000e+00 : f32
      %53 = vector.broadcast %cst_42 : f32 to vector<2x1xf32>
      %c0_43 = arith.constant 0 : index
      %c0_44 = arith.constant 0 : index
      %54 = vector.load %arg11[%c0_43, %c0_44] : memref<2x1xf32, #tpu.memory_space<vmem>>, vector<2x1xf32>
      tpu.vector_store %arg11[%c0_43, %c0_44], %53 {strides = array<i32>} : memref<2x1xf32, #tpu.memory_space<vmem>>, vector<2x1xf32>,
      %cst_45 = arith.constant 0.000000e+00 : f32
      %55 = vector.broadcast %cst_45 : f32 to vector<2x32xf32>
      %c0_46 = arith.constant 0 : index
      %c0_47 = arith.constant 0 : index
      %56 = vector.load %arg12[%c0_46, %c0_47] : memref<2x32xf32, #tpu.memory_space<vmem>>, vector<2x32xf32>
      tpu.vector_store %arg12[%c0_46, %c0_47], %55 {strides = array<i32>} : memref<2x32xf32, #tpu.memory_space<vmem>>, vector<2x32xf32>,
    } else {
    }
    %c0 = arith.constant 0 : index
    %c0_1 = arith.constant 0 : index
    %c0_2 = arith.constant 0 : index
    %3 = vector.load %arg2[%c0, %c0_1, %c0_2] : memref<8x2x32xf32, #tpu.memory_space<vmem>>, vector<8x2x32xf32>
    %c0_3 = arith.constant 0 : index
    %c0_4 = arith.constant 0 : index
    %4 = vector.load %arg8[%c0_3, %c0_4] : memref<2x32xf32, #tpu.memory_space<vmem>>, vector<2x32xf32>
    %cst = arith.constant dense<0.000000e+00> : vector<2x32xf32>
    %5 = vector.multi_reduction <add>, %3, %cst [0] : vector<8x2x32xf32> to vector<2x32xf32>
    %6 = arith.addf %4, %5 : vector<2x32xf32>
    %c0_5 = arith.constant 0 : index
    %c0_6 = arith.constant 0 : index
    %7 = vector.load %arg8[%c0_5, %c0_6] : memref<2x32xf32, #tpu.memory_space<vmem>>, vector<2x32xf32>
    tpu.vector_store %arg8[%c0_5, %c0_6], %6 {strides = array<i32>} : memref<2x32xf32, #tpu.memory_space<vmem>>, vector<2x32xf32>,
    %c0_7 = arith.constant 0 : index
    %c0_8 = arith.constant 0 : index
    %8 = vector.load %arg9[%c0_7, %c0_8] : memref<2x32xf32, #tpu.memory_space<vmem>>, vector<2x32xf32>
    %cst_9 = arith.constant dense<0xFF800000> : vector<2x32xf32>
    %9 = vector.multi_reduction <maximumf>, %3, %cst_9 [0] : vector<8x2x32xf32> to vector<2x32xf32>
    %10 = arith.maximumf %8, %9 : vector<2x32xf32>
    %c0_10 = arith.constant 0 : index
    %c0_11 = arith.constant 0 : index
    %11 = vector.load %arg9[%c0_10, %c0_11] : memref<2x32xf32, #tpu.memory_space<vmem>>, vector<2x32xf32>
    tpu.vector_store %arg9[%c0_10, %c0_11], %10 {strides = array<i32>} : memref<2x32xf32, #tpu.memory_space<vmem>>, vector<2x32xf32>,
    %c0_12 = arith.constant 0 : index
    %c0_13 = arith.constant 0 : index
    %12 = vector.load %arg3[%c0_12, %c0_13] : memref<1x32xf32, #tpu.memory_space<vmem>>, vector<1x32xf32>
    %13 = vector.shape_cast %12 : vector<1x32xf32> to vector<1x1x32xf32>
    %14 = vector.broadcast %13 : vector<1x1x32xf32> to vector<8x2x32xf32>
    %15 = arith.mulf %3, %14 : vector<8x2x32xf32>
    %cst_14 = arith.constant dense<0.000000e+00> : vector<8x2xf32>
    %16 = vector.multi_reduction <add>, %15, %cst_14 [2] : vector<8x2x32xf32> to vector<8x2xf32>
    %17 = vector.shape_cast %16 : vector<8x2xf32> to vector<8x2x1xf32>
    %c0_15 = arith.constant 0 : index
    %18 = memref.load %arg4[%c0_15] : memref<1xf32, #tpu.memory_space<smem>>
    %19 = vector.broadcast %18 : f32 to vector<8x2x1xf32>
    %20 = arith.addf %17, %19 : vector<8x2x1xf32>
    %c0_16 = arith.constant 0 : index
    %c0_17 = arith.constant 0 : index
    %21 = vector.load %arg10[%c0_16, %c0_17] : memref<2x1xf32, #tpu.memory_space<vmem>>, vector<2x1xf32>
    %cst_18 = arith.constant dense<0xFF800000> : vector<2x1xf32>
    %22 = vector.multi_reduction <maximumf>, %20, %cst_18 [0] : vector<8x2x1xf32> to vector<2x1xf32>
    %23 = arith.maximumf %21, %22 : vector<2x1xf32>
    %24 = arith.subf %21, %23 : vector<2x1xf32>
    %25 = math.exp %24 : vector<2x1xf32>
    %26 = vector.shape_cast %23 : vector<2x1xf32> to vector<1x2x1xf32>
    %27 = vector.broadcast %26 : vector<1x2x1xf32> to vector<8x2x1xf32>
    %28 = arith.subf %20, %27 : vector<8x2x1xf32>
    %29 = math.exp %28 : vector<8x2x1xf32>
    %c0_19 = arith.constant 0 : index
    %c0_20 = arith.constant 0 : index
    %30 = vector.load %arg11[%c0_19, %c0_20] : memref<2x1xf32, #tpu.memory_space<vmem>>, vector<2x1xf32>
    %31 = arith.mulf %25, %30 : vector<2x1xf32>
    %cst_21 = arith.constant dense<0.000000e+00> : vector<2x1xf32>
    %32 = vector.multi_reduction <add>, %29, %cst_21 [0] : vector<8x2x1xf32> to vector<2x1xf32>
    %33 = arith.addf %31, %32 : vector<2x1xf32>
    %c0_22 = arith.constant 0 : index
    %c0_23 = arith.constant 0 : index
    %34 = vector.load %arg11[%c0_22, %c0_23] : memref<2x1xf32, #tpu.memory_space<vmem>>, vector<2x1xf32>
    tpu.vector_store %arg11[%c0_22, %c0_23], %33 {strides = array<i32>} : memref<2x1xf32, #tpu.memory_space<vmem>>, vector<2x1xf32>,
    %c0_24 = arith.constant 0 : index
    %c0_25 = arith.constant 0 : index
    %35 = vector.load %arg12[%c0_24, %c0_25] : memref<2x32xf32, #tpu.memory_space<vmem>>, vector<2x32xf32>
    %36 = vector.broadcast %25 : vector<2x1xf32> to vector<2x32xf32>
    %37 = arith.mulf %36, %35 : vector<2x32xf32>
    %38 = vector.broadcast %29 : vector<8x2x1xf32> to vector<8x2x32xf32>
    %39 = arith.mulf %3, %38 : vector<8x2x32xf32>
    %cst_26 = arith.constant dense<0.000000e+00> : vector<2x32xf32>
    %40 = vector.multi_reduction <add>, %39, %cst_26 [0] : vector<8x2x32xf32> to vector<2x32xf32>
    %41 = arith.addf %37, %40 : vector<2x32xf32>
    %c0_27 = arith.constant 0 : index
    %c0_28 = arith.constant 0 : index
    %42 = vector.load %arg12[%c0_27, %c0_28] : memref<2x32xf32, #tpu.memory_space<vmem>>, vector<2x32xf32>
    tpu.vector_store %arg12[%c0_27, %c0_28], %41 {strides = array<i32>} : memref<2x32xf32, #tpu.memory_space<vmem>>, vector<2x32xf32>,
    %c0_29 = arith.constant 0 : index
    %c0_30 = arith.constant 0 : index
    %43 = vector.load %arg10[%c0_29, %c0_30] : memref<2x1xf32, #tpu.memory_space<vmem>>, vector<2x1xf32>
    tpu.vector_store %arg10[%c0_29, %c0_30], %23 {strides = array<i32>} : memref<2x1xf32, #tpu.memory_space<vmem>>, vector<2x1xf32>,
    %c0_i32_31 = arith.constant 0 : i32
    %44 = arith.cmpi eq, %arg1, %c0_i32_31 : i32
    %45 = arith.extui %44 : i1 to i32
    %c0_i32_32 = arith.constant 0 : i32
    %46 = arith.cmpi ne, %45, %c0_i32_32 : i32
    scf.if %46 {
      %c0_33 = arith.constant 0 : index
      %c0_34 = arith.constant 0 : index
      %47 = vector.load %arg8[%c0_33, %c0_34] : memref<2x32xf32, #tpu.memory_space<vmem>>, vector<2x32xf32>
      %cst_35 = arith.constant 1.250000e-01 : f32
      %48 = vector.broadcast %cst_35 : f32 to vector<2x32xf32>
      %49 = arith.mulf %47, %48 : vector<2x32xf32>
      %c0_36 = arith.constant 0 : index
      %c0_37 = arith.constant 0 : index
      %50 = vector.load %arg9[%c0_36, %c0_37] : memref<2x32xf32, #tpu.memory_space<vmem>>, vector<2x32xf32>
      %c0_38 = arith.constant 0 : index
      %c0_39 = arith.constant 0 : index
      %51 = vector.load %arg11[%c0_38, %c0_39] : memref<2x1xf32, #tpu.memory_space<vmem>>, vector<2x1xf32>
      %52 = tpu.reciprocal %51 {approx = true} : vector<2x1xf32> -> vector<2x1xf32>
      %c0_40 = arith.constant 0 : index
      %c0_41 = arith.constant 0 : index
      %53 = vector.load %arg11[%c0_40, %c0_41] : memref<2x1xf32, #tpu.memory_space<vmem>>, vector<2x1xf32>
      %54 = arith.mulf %53, %52 : vector<2x1xf32>
      %cst_42 = arith.constant 2.000000e+00 : f32
      %55 = vector.broadcast %cst_42 : f32 to vector<2x1xf32>
      %56 = arith.subf %55, %54 : vector<2x1xf32>
      %57 = arith.mulf %52, %56 : vector<2x1xf32>
      %c0_43 = arith.constant 0 : index
      %c0_44 = arith.constant 0 : index
      %58 = vector.load %arg12[%c0_43, %c0_44] : memref<2x32xf32, #tpu.memory_space<vmem>>, vector<2x32xf32>
      %59 = vector.broadcast %57 : vector<2x1xf32> to vector<2x32xf32>
      %60 = arith.mulf %58, %59 : vector<2x32xf32>
      %c0_45 = arith.constant 0 : index
      %c0_46 = arith.constant 0 : index
      %61 = vector.load %arg5[%c0_45, %c0_46] : memref<96x32xf32, #tpu.memory_space<vmem>>, vector<32x32xf32>
      %cst_47 = arith.constant dense<0.000000e+00> : vector<2x32xf32>
      %62 = tpu.matmul %49, %61, %cst_47 {dimension_numbers = #tpu.dot_dimension_numbers<[1], [0], [0], [1], [0, 0, 1, 1], [], []>} : vector<2x32xf32>, vector<32x32xf32>, vector<2x32xf32> -> vector<2x32xf32>
      %c32 = arith.constant 32 : index
      %c0_48 = arith.constant 0 : index
      %63 = vector.load %arg5[%c32, %c0_48] : memref<96x32xf32, #tpu.memory_space<vmem>>, vector<32x32xf32>
      %cst_49 = arith.constant dense<0.000000e+00> : vector<2x32xf32>
      %64 = tpu.matmul %50, %63, %cst_49 {dimension_numbers = #tpu.dot_dimension_numbers<[1], [0], [0], [1], [0, 0, 1, 1], [], []>} : vector<2x32xf32>, vector<32x32xf32>, vector<2x32xf32> -> vector<2x32xf32>
      %65 = arith.addf %62, %64 : vector<2x32xf32>
      %c64 = arith.constant 64 : index
      %c0_50 = arith.constant 0 : index
      %66 = vector.load %arg5[%c64, %c0_50] : memref<96x32xf32, #tpu.memory_space<vmem>>, vector<32x32xf32>
      %cst_51 = arith.constant dense<0.000000e+00> : vector<2x32xf32>
      %67 = tpu.matmul %60, %66, %cst_51 {dimension_numbers = #tpu.dot_dimension_numbers<[1], [0], [0], [1], [0, 0, 1, 1], [], []>} : vector<2x32xf32>, vector<32x32xf32>, vector<2x32xf32> -> vector<2x32xf32>
      %68 = arith.addf %65, %67 : vector<2x32xf32>
      %c0_52 = arith.constant 0 : index
      %c0_53 = arith.constant 0 : index
      %69 = vector.load %arg6[%c0_52, %c0_53] : memref<1x32xf32, #tpu.memory_space<vmem>>, vector<1x32xf32>
      %70 = vector.broadcast %69 : vector<1x32xf32> to vector<2x32xf32>
      %71 = arith.addf %68, %70 : vector<2x32xf32>
      %c0_54 = arith.constant 0 : index
      %c0_55 = arith.constant 0 : index
      %72 = vector.load %arg7[%c0_54, %c0_55] : memref<2x32xf32, #tpu.memory_space<vmem>>, vector<2x32xf32>
      tpu.vector_store %arg7[%c0_54, %c0_55], %71 {strides = array<i32>} : memref<2x32xf32, #tpu.memory_space<vmem>>, vector<2x32xf32>,
    } else {
    }
    return
  }
  func.func @transform_0(%arg0: i32, %arg1: i32) -> (i32, i32, i32) {
    %c0_i32 = arith.constant 0 : i32
    %c0_i32_0 = arith.constant 0 : i32
    return %arg1, %arg0, %c0_i32 : i32, i32, i32
  }
  func.func @transform_1(%arg0: i32, %arg1: i32) -> (i32, i32) {
    %c0_i32 = arith.constant 0 : i32
    %c0_i32_0 = arith.constant 0 : i32
    %c0_i32_1 = arith.constant 0 : i32
    return %c0_i32, %c0_i32_0 : i32, i32
  }
  func.func @transform_2(%arg0: i32, %arg1: i32) -> i32 {
    %c0_i32 = arith.constant 0 : i32
    %c0_i32_0 = arith.constant 0 : i32
    return %c0_i32 : i32
  }
  func.func @transform_3(%arg0: i32, %arg1: i32) -> (i32, i32) {
    %c0_i32 = arith.constant 0 : i32
    %c0_i32_0 = arith.constant 0 : i32
    %c0_i32_1 = arith.constant 0 : i32
    return %c0_i32, %c0_i32_0 : i32, i32
  }
  func.func @transform_4(%arg0: i32, %arg1: i32) -> (i32, i32) {
    %c0_i32 = arith.constant 0 : i32
    %c0_i32_0 = arith.constant 0 : i32
    %c0_i32_1 = arith.constant 0 : i32
    return %c0_i32, %c0_i32_0 : i32, i32
  }
  func.func @transform_5(%arg0: i32, %arg1: i32) -> (i32, i32) {
    %c0_i32 = arith.constant 0 : i32
    %c0_i32_0 = arith.constant 0 : i32
    return %arg0, %c0_i32 : i32, i32
  }
}

</mosaic_0001>

<bundles_post_ra>
// kernel: tpu_custom_call.1
= control target key start
LH: loop header
LB: loop body
LE: loop exit
PB: predicated region body
PF: predicated region fallthrough
CT: control target
= control target key end

     0   :  { %vm26_vm0 = vcmask 254976   ;;  %v662_v5 = vmov 0.0   ;;  %s898_s0 = inlined_call_operand.vmem [shape: f32[8,2,32], index: 0, kind: input, shape index: {}]   ;;  %s899_s1 = inlined_call_operand.vmem [shape: f32[1,32], index: 1, kind: input, shape index: {}]   ;;  %s900_s2 = inlined_call_operand.<no memory space> [shape: f32[1], index: 2, kind: input, shape index: {}]   ;;  %s901_s3 = inlined_call_operand.vmem [shape: f32[96,32], index: 3, kind: input, shape index: {}]   ;;  %s902_s4 = inlined_call_operand.vmem [shape: f32[1,32], index: 4, kind: input, shape index: {}]   ;;  %s903_s5 = inlined_call_operand.hbm [shape: f32[2,32], index: 5, kind: output, shape index: {}]  }
   0x1   :  { %v701_v0 = vld [vmem:[%s898_s0 + $0x4] sm:$0x3]  ;;  %v539_v1 = vld [vmem:[%s899_s1] ss:$0 sm:$0xff]  ;;  %v715_v4 = vld [vmem:[%s898_s0 + $0x6] sm:$0x3] }
   0x2   :  { %v87_v2 = vmul.f32 %v539_v1, %v701_v0  ;;  %v710_v3 = vld [vmem:[%s898_s0] sm:$0x3]  ;;  %27 = vst.msk [vmem:[#allocation2] sm:$0x3] %vm26_vm0, %v662_v5  ;;  %32 = vst.msk [vmem:[#allocation6] sm:$0x3] %vm26_vm0, %v662_v5  ;;  %v88_v8 = vmul.f32 %v539_v1, %v715_v4 }
   0x3   :  { %v85_v6 = vmul.f32 %v539_v1, %v710_v3  ;;  %v43_v7 = vsel %vm26_vm0, %v710_v3, 0.0  ;;  %v728_v9 = vld [vmem:[%s898_s0 + $0x2] sm:$0x3]  ;;  %v733_v10 = vld [vmem:[%s898_s0 + $0xa] sm:$0x3]  ;;  %v46_v12 = vsel %vm26_vm0, %v701_v0, 0.0 }
   0x4   :  { %v99_v11 = vsel %vm26_vm0, %v87_v2, 0.0  ;;  %v61_v13 = vsel %vm26_vm0, %v710_v3, -inf  ;;  %v86_v14 = vmul.f32 %v539_v1, %v728_v9  ;;  %v744_v15 = vld [vmem:[%s898_s0 + $0x8] sm:$0x3]  ;;  %v48_v17 = vsel %vm26_vm0, %v715_v4, 0.0 }
   0x5   :  { %100 = vadd.xlane.f32.xlu1 %v99_v11  ;;  %v93_v16 = vsel %vm26_vm0, %v85_v6, 0.0  ;;  %v44_v18 = vsel %vm26_vm0, %v728_v9, 0.0  ;;  %v62_v19 = vsel %vm26_vm0, %v728_v9, -inf  ;;  %v102_v20 = vsel %vm26_vm0, %v88_v8, 0.0 }
   0x6   :  { %94 = vadd.xlane.f32.xlu0 %v93_v16  ;;  %v64_v21 = vsel %vm26_vm0, %v715_v4, -inf  ;;  %v45_v22 = vadd.f32 %v44_v18, %v43_v7  ;;  %v90_v23 = vmul.f32 %v539_v1, %v733_v10 }
   0x7   :  { %11 = vsyncpa [#allocation9], 0  ;;  %v96_v24 = vsel %vm26_vm0, %v86_v14, 0.0  ;;  %v67_v25 = vsel %vm26_vm0, %v733_v10, -inf  ;;  %v89_v26 = vmul.f32 %v539_v1, %v744_v15  ;;  %v65_v27 = vsel %vm26_vm0, %v744_v15, -inf  ;;  %s667_s9 = smov [#allocation8]  }
   0x8   :  { %v766_v28 = vld [vmem:[%s898_s0 + $0xe] sm:$0x3]  ;;  %v47_v29 = vadd.f32 %v46_v12, %v45_v22  ;;  %v68_v30 = vmax.f32 %v62_v19, %v67_v25  ;;  %v66_v31 = vmax.f32 %v61_v13, %v65_v27  ;;  %v771_v32 = vld [vmem:[%s898_s0 + $0xc] sm:$0x3]  ;;  %v63_v33 = vsel %vm26_vm0, %v701_v0, -inf  ;;  %s531_s0 = sshll.u32 %s667_s9, 4  ;;  %s532_s0 = int_to_ptr.vmem [resolvable:$true] %s531_s0 }
   0x9   :  { %103 = vadd.xlane.f32.xlu1 %v102_v20  ;;  %v108_v34 = vsel %vm26_vm0, %v90_v23, 0.0  ;;  %v50_v35 = vsel %vm26_vm0, %v744_v15, 0.0  ;;  %v71_v36 = vsel %vm26_vm0, %v766_v28, -inf  ;;  %v92_v38 = vmul.f32 %v539_v1, %v766_v28  ;;  %v41_v56 = vld [vmem:[#allocation2] sm:$0x3]  ;;  %s638_s10 = scalar_lea.vmem %s532_s0, 32  ;;  %p643_p1 = scmp.lt.s32.totalorder %s532_s0, %s532_s0 }
   0xa   :  { %97 = vadd.xlane.f32.xlu0 %v96_v24  ;;  %v49_v37 = vadd.f32 %v48_v17, %v47_v29  ;;  %v72_v39 = vmax.f32 %v64_v21, %v71_v36  ;;  %v52_v40 = vsel %vm26_vm0, %v733_v10, 0.0  ;;  %v105_v41 = vsel %vm26_vm0, %v89_v26, 0.0  ;;  %p639_p0 = scmp.ne.s32.totalorder %s532_s0, %s638_s10  ;;  %p644_p2 = scmp.lt.s32.totalorder %s638_s10, %s638_s10 }
   0xb   :  { %v91_v42 = vmul.f32 %v539_v1, %v771_v32  ;;  %v663_v43 = vmov -inf   ;;  %v69_v44 = vsel %vm26_vm0, %v771_v32, -inf  ;;  %v73_v46 = vmax.f32 %v66_v31, %v68_v30 }
   0xc   :  { %28 = vst.msk [vmem:[#allocation3] sm:$0x3] %vm26_vm0, %v663_v43  ;;  %v51_v45 = vadd.f32 %v50_v35, %v49_v37  ;;  %v70_v47 = vmax.f32 %v63_v33, %v69_v44  ;;  %v54_v48 = vsel %vm26_vm0, %v771_v32, 0.0  ;;  %v114_v49 = vsel %vm26_vm0, %v92_v38, 0.0  ;;  %p645_p3 = por %p644_p2, %p643_p1 }
   0xd   :  { %109 = vadd.xlane.f32.xlu1 %v108_v34  ;;  %v56_v52 = vsel %vm26_vm0, %v766_v28, 0.0  ;;  %v111_v53 = vsel %vm26_vm0, %v91_v42, 0.0  ;;  %vm29_vm1 = vcmask 1024   ;;  %v664_v61 = vmov 0  }
   0xe   :  { %106 = vadd.xlane.f32.xlu0 %v105_v41  ;;  %v53_v50 = vadd.f32 %v52_v40, %v51_v45  ;;  %v74_v51 = vmax.f32 %v70_v47, %v72_v39  ;;  %30 = vst.msk [vmem:[#allocation4] sm:$0x3] %vm29_vm1, %v663_v43  ;;  %31 = vst.msk [vmem:[#allocation5] sm:$0x3] %vm29_vm1, %v662_v5  ;;  %617 = vset.pattern.permute.xlu1 %v664_v61  ;;  %v118_v6 = vstv %s900_s2  ;;  %vm128_vm2 = vcmask 1041408   ;;  %p646_p4 = pnand %p645_p3, %p639_p0 }
   0xf   :  { %616 = vset.pattern.permute.xlu0 %v664_v61  ;;  %vm666_vm3 = vmmov 0   ;;  %vm291_vm4 = vcmask 261120  }
  0x10   :  { %v55_v54 = vadd.f32 %v54_v48, %v53_v50  ;;  %v75_v55 = vmax.f32 %v73_v46, %v74_v51  ;;  %567 = vmatprep.mubr.msk.f32.mxu0 %vm666_vm3, %v662_v5  ;;  %578 = vmatprep.mubr.msk.f32.mxu1 %vm666_vm3, %v662_v5 }
  0x11   :  { %115 = vadd.xlane.f32.xlu1 %v114_v49 }
  0x12   :  { %112 = vadd.xlane.f32.xlu0 %v111_v53  ;;  %v57_v57 = vadd.f32 %v56_v52, %v55_v54 }
  0x13   :  { %v60_v58 = vld [vmem:[#allocation3] sm:$0x3] }
  0x14   :  { %v76_v59 = vmax.f32 %v60_v58, %v75_v55  ;;  %v58_v60 = vadd.f32 %v57_v57, %v41_v56 }
  0x15   :  { %v127_v38 = vld [vmem:[#allocation4] sm:$0x3] }
  0x16   :  { %77 = vst.msk [vmem:[#allocation3] sm:$0x3] %vm26_vm0, %v76_v59  ;;  %59 = vst.msk [vmem:[#allocation2] sm:$0x3] %vm26_vm0, %v58_v60 }
  0x92   :  { %v101_v62 = vpop.xlane.xlu1 %100 }
  0x93   :  { %v95_v63 = vpop.xlane.xlu0 %94  ;;  %v121_v17 = vadd.f32 %v118_v6, %v101_v62 }
  0x94   :  { %v119_v12 = vadd.f32 %v118_v6, %v95_v63 }
  0x95   :  { %v131_v31 = vsel %vm128_vm2, %v121_v17, -inf }
  0x96   :  { %v104_v1 = vpop.xlane.xlu1 %103  ;;  %v129_v23 = vsel %vm128_vm2, %v119_v12, -inf }
  0x97   :  { %v98_v2 = vpop.xlane.xlu0 %97  ;;  %v122_v16 = vadd.f32 %v118_v6, %v104_v1 }
  0x98   :  { %v120_v13 = vadd.f32 %v118_v6, %v98_v2 }
  0x99   :  { %v132_v26 = vsel %vm128_vm2, %v122_v16, -inf }
  0x9a   :  { %v110_v7 = vpop.xlane.xlu1 %109  ;;  %v130_v24 = vsel %vm128_vm2, %v120_v13, -inf }
  0x9b   :  { %v124_v8 = vadd.f32 %v118_v6, %v110_v7  ;;  %v107_v11 = vpop.xlane.xlu0 %106 }
  0x9c   :  { %v123_v14 = vadd.f32 %v118_v6, %v107_v11 }
  0x9d   :  { %v135_v18 = vsel %vm128_vm2, %v124_v8, -inf }
  0x9e   :  { %v133_v19 = vsel %vm128_vm2, %v123_v14, -inf  ;;  %v116_v20 = vpop.xlane.xlu1 %115  ;;  %v136_v27 = vmax.f32 %v130_v24, %v135_v18 }
  0x9f   :  { %v126_v21 = vadd.f32 %v118_v6, %v116_v20  ;;  %v113_v22 = vpop.xlane.xlu0 %112  ;;  %v134_v29 = vmax.f32 %v129_v23, %v133_v19 }
  0xa0   :  { %v125_v25 = vadd.f32 %v118_v6, %v113_v22  ;;  %v172_v22 = vld [vmem:[#allocation5] sm:$0x3] }
  0xa1   :  { %v139_v30 = vsel %vm128_vm2, %v126_v21, -inf  ;;  %v141_v36 = vmax.f32 %v134_v29, %v136_v27 }
  0xa2   :  { %v140_v33 = vmax.f32 %v132_v26, %v139_v30  ;;  %v137_v34 = vsel %vm128_vm2, %v125_v25, -inf }
  0xa3   :  { %v138_v35 = vmax.f32 %v131_v31, %v137_v34  ;;  %v287_v31 = vld [vmem:[%s901_s3 + $0x20] sm:$0xff] }
  0xa4   :  { %v283_v34 = vld [vmem:[%s901_s3] sm:$0xff] }
  0xa5   :  { %v142_v37 = vmax.f32 %v138_v35, %v140_v33  ;;  %v288_v33 = vld [vmem:[%s901_s3 + $0x28] sm:$0xff]  ;;  %v665_v35 = vmov 0.0|0.0  }
  0xa6   :  { %592 = vmatprep.subr.bf16.mxu0 %v665_v35  ;;  %598 = vmatprep.subr.bf16.mxu1 %v665_v35 }
  0xa7   :  { %v143_v39 = vmax.f32 %v141_v36, %v142_v37  ;;  %v593_v36 = vpack.c.bf16 %v288_v33, %v287_v31  ;;  %v284_v37 = vld [vmem:[%s901_s3 + $0x8] sm:$0xff] }
  0xa9   :  { %v144_v40 = vmax.f32 %v127_v38, %v143_v39  ;;  %v290_v39 = vld [vmem:[%s901_s3 + $0x38] sm:$0xff]  ;;  %594 = vmatpush3.bf16.msra.mxu0 %v593_v36 }
  0xaa   :  { %595 = vmatprep.subr.bf16.mxu0 %v665_v35 }
  0xab   :  { %v148_v41 = vsub.f32 %v119_v12, %v144_v40  ;;  %v149_v42 = vsub.f32 %v120_v13, %v144_v40  ;;  %v150_v43 = vsub.f32 %v121_v17, %v144_v40  ;;  %264 = vst.msk [vmem:[#allocation4] sm:$0x3] %vm29_vm1, %v144_v40  ;;  %v151_v44 = vsub.f32 %v122_v16, %v144_v40 }
  0xac   :  { %v152_v45 = vsub.f32 %v123_v14, %v144_v40  ;;  %v153_v49 = vsub.f32 %v124_v8, %v144_v40  ;;  %v154_v51 = vsub.f32 %v125_v25, %v144_v40  ;;  %v155_v53 = vsub.f32 %v126_v21, %v144_v40 }
  0xad   :  { %v156_v46 = vmul.f32 1.442695, %v148_v41  ;;  %v158_v47 = vmul.f32 1.442695, %v149_v42  ;;  %v160_v48 = vmul.f32 1.442695, %v150_v43  ;;  %v145_v55 = vsub.f32 %v127_v38, %v144_v40 }
  0xae   :  { %v162_v50 = vmul.f32 1.442695, %v151_v44  ;;  %v164_v52 = vmul.f32 1.442695, %v152_v45  ;;  %v166_v54 = vmul.f32 1.442695, %v153_v49  ;;  %v599_v40 = vpack.c.bf16 %v284_v37, %v283_v34 }
  0xaf   :  { %618 = vpow2.f32 %v156_v46  ;;  %v168_v56 = vmul.f32 1.442695, %v154_v51  ;;  %v170_v57 = vmul.f32 1.442695, %v155_v53  ;;  %v146_v58 = vmul.f32 1.442695, %v145_v55 }
  0xb0   :  { %620 = vpow2.f32 %v158_v47  ;;  %v289_v38 = vld [vmem:[%s901_s3 + $0x30] sm:$0xff]  ;;  %v286_v42 = vld [vmem:[%s901_s3 + $0x18] sm:$0xff]  ;;  %600 = vmatpush3.bf16.msra.mxu1 %v599_v40  ;;  %v268_v47 = vld [vmem:[#allocation2] sm:$0x3] }
  0xb1   :  { %622 = vpow2.f32 %v160_v48  ;;  %v285_v41 = vld [vmem:[%s901_s3 + $0x10] sm:$0xff]  ;;  %v596_v44 = vpack.c.bf16 %v290_v39, %v289_v38  ;;  %v438_v48 = vld [vmem:[%s901_s3 + $0x40] sm:$0xff]  ;;  %v439_v49 = vld [vmem:[%s901_s3 + $0x48] sm:$0xff]  ;;  %601 = vmatprep.subr.bf16.mxu1 %v665_v35 }
  0xb2   :  { %624 = vpow2.f32 %v162_v50  ;;  %v602_v46 = vpack.c.bf16 %v286_v42, %v285_v41  ;;  %v270_v51 = vld [vmem:[#allocation3] sm:$0x3]  ;;  %v605_v53 = vpack.c.bf16 %v439_v49, %v438_v48  ;;  %v440_v55 = vld [vmem:[%s901_s3 + $0x50] sm:$0xff]  ;;  %v543_v38 = vld [vmem:[%s902_s4] ss:$0 sm:$0xff] }
  0xb3   :  { %626 = vpow2.f32 %v164_v52  ;;  %597 = vmatpush3.bf16.msra.mxu0 %v596_v44  ;;  %v269_v52 = vmul.f32 0.125, %v268_v47 }
  0xb4   :  { %628 = vpow2.f32 %v166_v54  ;;  %603 = vmatpush3.bf16.msra.mxu1 %v602_v46  ;;  %604 = vmatprep.subr.bf16.mxu0 %v665_v35 }
  0xb5   :  { %630 = vpow2.f32 %v168_v56  ;;  %v441_v56 = vld [vmem:[%s901_s3 + $0x58] sm:$0xff] }
  0xb6   :  { %632 = vpow2.f32 %v170_v57  ;;  %568 = vmatmul.mubr.msk.f32.vlgmr.msra.gmra.mrb[0].mxu0 %vm291_vm4, %v270_v51  ;;  %v608_v57 = vpack.c.bf16 %v441_v56, %v440_v55 }
  0xb7   :  { %634 = vpow2.f32 %v146_v58  ;;  %579 = vmatmul.mubr.msk.f32.vlgmr.msra.gmra.mrb[0].mxu1 %vm291_vm4, %v269_v52  ;;  %606 = vmatpush3.bf16.msra.mxu0 %v605_v53 }
  0xb8   :  { %607 = vmatprep.subr.bf16.mxu0 %v665_v35  ;;  %589 = vmatprep.mubr.msk.f32.mxu0 %vm666_vm3, %v662_v5 }
  0xb9   :  { %v619_v59 = vpop.eup %618 }
  0xba   :  { %v621_v60 = vpop.eup %620  ;;  %v175_v61 = vsel %vm29_vm1, %v619_v59, 0.0  ;;  %201 = vperm.xlu0 %616, %v619_v59  }
  0xbb   :  { %v623_v62 = vpop.eup %622  ;;  %v176_v63 = vsel %vm29_vm1, %v621_v60, 0.0  ;;  %206 = vperm.xlu1 %617, %v621_v60   ;;  %609 = vmatpush3.bf16.msra.mxu0 %v608_v57 }
  0xbc   :  { %v625_v1 = vpop.eup %624  ;;  %v177_v2 = vadd.f32 %v176_v63, %v175_v61  ;;  %v178_v6 = vsel %vm29_vm1, %v623_v62, 0.0 }
  0xbd   :  { %v627_v7 = vpop.eup %626  ;;  %v180_v11 = vsel %vm29_vm1, %v625_v1, 0.0 }
  0xbe   :  { %v179_v8 = vadd.f32 %v178_v6, %v177_v2  ;;  %v629_v12 = vpop.eup %628  ;;  %v182_v14 = vsel %vm29_vm1, %v627_v7, 0.0 }
  0xbf   :  { %211 = vperm.xlu1 %617, %v623_v62   ;;  %v631_v16 = vpop.eup %630  ;;  %v184_v18 = vsel %vm29_vm1, %v629_v12, 0.0 }
  0xc0   :  { %v181_v13 = vadd.f32 %v180_v11, %v179_v8  ;;  %v633_v19 = vpop.eup %632  ;;  %v186_v23 = vsel %vm29_vm1, %v631_v16, 0.0 }
  0xc1   :  { %v635_v21 = vpop.eup %634  ;;  %v188_v25 = vsel %vm29_vm1, %v633_v19, 0.0 }
  0xc2   :  { %v183_v17 = vadd.f32 %v182_v14, %v181_v13  ;;  %v173_v26 = vmul.f32 %v635_v21, %v172_v22 }
  0xc3   :  { %216 = vperm.xlu1 %617, %v625_v1  }
  0xc4   :  { %v185_v20 = vadd.f32 %v184_v18, %v183_v17 }
  0xc6   :  { %v187_v24 = vadd.f32 %v186_v23, %v185_v20 }
  0xc7   :  { %221 = vperm.xlu1 %617, %v627_v7  }
  0xc8   :  { %v189_v27 = vadd.f32 %v188_v25, %v187_v24  ;;  %v192_v24 = vld [vmem:[#allocation6] sm:$0x3] }
  0xca   :  { %v190_v29 = vadd.f32 %v189_v27, %v173_v26 }
  0xcb   :  { %226 = vperm.xlu1 %617, %v629_v12  }
  0xcc   :  { %191 = vst.msk [vmem:[#allocation5] sm:$0x3] %vm29_vm1, %v190_v29 }
  0xcf   :  { %231 = vperm.xlu1 %617, %v631_v16  }
  0xd3   :  { %236 = vperm.xlu1 %617, %v633_v19   ;;  %v271_v30 = vld [vmem:[#allocation5] sm:$0x3] }
  0xd4   :  { %636 = vrcp.f32 %v271_v30 }
  0xd7   :  { %195 = vperm.xlu1 %617, %v635_v21  }
  0xde   :  { %v637_v43 = vpop.eup %636 }
  0xdf   :  { %v273_v45 = vmul.f32 %v637_v43, %v271_v30 }
  0xe1   :  { %v274_v50 = vsub.f32 2.0, %v273_v45 }
  0xe3   :  { %v275_v54 = vmul.f32 %v637_v43, %v274_v50 }
  0xe5   :  { %279 = vperm.xlu0 %616, %v275_v54  }
 0x139   :  { %v202_v60 = vpop.permute.xlu0 %201 }
 0x13a   :  { %v207_v58 = vpop.permute.xlu1 %206  ;;  %v239_v63 = vmul.f32 %v202_v60, %v710_v3 }
 0x13b   :  { %v240_v62 = vmul.f32 %v207_v58, %v728_v9 }
 0x13c   :  { %v247_v7 = vsel %vm26_vm0, %v239_v63, 0.0 }
 0x13d   :  { %v248_v6 = vsel %vm26_vm0, %v240_v62, 0.0 }
 0x13e   :  { %v212_v59 = vpop.permute.xlu1 %211  ;;  %v249_v12 = vadd.f32 %v248_v6, %v247_v7 }
 0x13f   :  { %v241_v1 = vmul.f32 %v212_v59, %v701_v0 }
 0x141   :  { %v250_v5 = vsel %vm26_vm0, %v241_v1, 0.0 }
 0x142   :  { %v217_v61 = vpop.permute.xlu1 %216  ;;  %v251_v3 = vadd.f32 %v250_v5, %v249_v12 }
 0x143   :  { %v242_v8 = vmul.f32 %v217_v61, %v715_v4 }
 0x145   :  { %v252_v14 = vsel %vm26_vm0, %v242_v8, 0.0 }
 0x146   :  { %v222_v2 = vpop.permute.xlu1 %221  ;;  %v253_v16 = vadd.f32 %v252_v14, %v251_v3 }
 0x147   :  { %v243_v11 = vmul.f32 %v222_v2, %v744_v15 }
 0x149   :  { %v254_v0 = vsel %vm26_vm0, %v243_v11, 0.0 }
 0x14a   :  { %v227_v13 = vpop.permute.xlu1 %226  ;;  %v255_v4 = vadd.f32 %v254_v0, %v253_v16 }
 0x14b   :  { %v244_v9 = vmul.f32 %v227_v13, %v733_v10 }
 0x14d   :  { %v256_v18 = vsel %vm26_vm0, %v244_v9, 0.0 }
 0x14e   :  { %v232_v17 = vpop.permute.xlu1 %231  ;;  %v257_v21 = vadd.f32 %v256_v18, %v255_v4 }
 0x14f   :  { %v245_v19 = vmul.f32 %v232_v17, %v771_v32 }
 0x151   :  { %v258_v20 = vsel %vm26_vm0, %v245_v19, 0.0 }
 0x152   :  { %v237_v15 = vpop.permute.xlu1 %236  ;;  %v259_v23 = vadd.f32 %v258_v20, %v257_v21 }
 0x153   :  { %v246_v22 = vmul.f32 %v237_v15, %v766_v28 }
 0x155   :  { %v260_v10 = vsel %vm26_vm0, %v246_v22, 0.0 }
 0x156   :  { %v261_v25 = vadd.f32 %v260_v10, %v259_v23  ;;  %v196_v26 = vpop.permute.xlu1 %195 }
 0x157   :  { %v198_v27 = vmul.f32 %v196_v26, %v192_v24 }
 0x159   :  { %v262_v29 = vadd.f32 %v261_v25, %v198_v27 }
 0x15b   :  { %263 = vst.msk [vmem:[#allocation6] sm:$0x3] %vm26_vm0, %v262_v29 }
 0x162   :  { %v276_v31 = vld [vmem:[#allocation6] sm:$0x3] }
 0x164   :  { %v280_v30 = vpop.permute.xlu0 %279 }
 0x165   :  { %v282_v32 = vmul.f32 %v280_v30, %v276_v31 }
 0x167   :  { %590 = vmatmul.mubr.msk.f32.vlgmr.msra.gmra.mrb[2].mxu0 %vm291_vm4, %v282_v32 }
 0x189   :  { %v361_v33 = vpop.f32.mrb[0].mxu0 }
 0x18a   :  { %v569_v34 = vpop.f32.mrb[1].mxu0  ;;  %v434_v35 = vpop.f32.mrb[0].mxu1 }
 0x18b   :  { %v435_v36 = vadd.f32 %v434_v35, %v361_v33  ;;  %v580_v28 = vpop.f32.mrb[1].mxu1 }
 0x23a   :  { %v511_v37 = vpop.f32.mrb[2].mxu0 }
 0x23b   :  { %v515_v39 = vadd.f32 %v511_v37, %v435_v36  ;;  %v591_v40 = vpop.f32.mrb[3].mxu0 }
 0x23d   :  { %v523_v41 = vadd.f32 %v543_v38, %v515_v39 }
 0x23f   :  { %524 = vst.msk [vmem:[#allocation8] sm:$0x3] %vm26_vm0, %v523_v41 }
 0x240   :  { %649 = shalt.err (!%p646_p4)
}
 0x241   :  { %s650_s12 = scalar_lea.hbm %s903_s5, 32 }
 0x242   :  { %p651_p5 = scmp.ne.s32.totalorder %s903_s5, %s650_s12  ;;  %p654_p6 = scmp.lt.u32.totalorder %s650_s12, %s903_s5 }
 0x244   :  { %p656_p7 = pnand %p654_p6, %p651_p5 }
 0x246   :  { %659 = shalt.err (!%p656_p7)
}
 0x247   :  { %534 = dma.vmem_to_hbm [thread:$0]  %s532_s0, 32, %s903_s5, [#allocation9]  }
 0x248   :  { %660 = dma.done.wait [#allocation9], 32  }
 0x249   :  { %661 = vsyncadd [#allocation9], 4294967264 }
 0x24a   :  { %538 = vsyncpa [#allocation9], 1 }

</bundles_post_ra>
